<compile_context>
chip_gen: v7x
topology: tpu7x:2x2x1
jax: 0.10.0
libtpu: 0.0.40
codegen_flags: <defaults>
</compile_context>

<pallas_src>
import jax
import jax.numpy as jnp
from jax import lax
from jax.experimental import pallas as pl
from jax.experimental.pallas import tpu as pltpu


# ----------------------------------------------------------------------------
# Kernel
# ----------------------------------------------------------------------------
def _semhead_kernel(x_ref, w_ref, b_ref, o_ref):
    # x_ref: (nb, Cin, hw)   w_ref: (Cout, Cin)   b_ref: (Cout, 1)
    # o_ref: (nb, Cout, hw)
    w = w_ref[...]
    b = b_ref[...]
    # nb is a small, static trip count -> statically unrolled loop.
    for i in range(x_ref.shape[0]):
        y = jnp.dot(
            w,
            x_ref[i],
            preferred_element_type=jnp.float32,
            precision=lax.Precision.HIGHEST,
        )
        o_ref[i] = (y + b).astype(o_ref.dtype)


# ----------------------------------------------------------------------------
# pallas_call wrapper
# ----------------------------------------------------------------------------
def sem_head_conv1x1(x_nchw, weight, bias):
    """1x1 conv (nn.Conv2d(Cin, Cout, kernel_size=1, padding=0)) computed as a
    channels-first matmul with the spatial axis (H*W) on the lane axis."""
    N, Cin, H, W = x_nchw.shape
    Cout = weight.shape[0]
    HW = H * W

    x_flat = x_nchw.reshape(N, Cin, HW)          # free reshape, native dtype
    w2 = weight.reshape(Cout, Cin)               # also accepts (Cout,Cin,1,1)
    b2 = bias.reshape(Cout, 1)
    out_dtype = x_nchw.dtype                     # conv output follows input dtype

    # Pick a <=2-step grid so v7x's two TensorCores both get work, while
    # single-TC v5e/v6e pay at most one extra grid step.
    if N >= 2 and N % 2 == 0:
        grid = (2,)
        nb = N // 2
        x_spec = pl.BlockSpec((nb, Cin, HW), lambda g: (g, 0, 0))
        o_spec = pl.BlockSpec((nb, Cout, HW), lambda g: (g, 0, 0))
    elif N == 1 and HW % 256 == 0:
        grid = (2,)
        hw_blk = HW // 2                          # multiple of 128 -> unmasked vst
        x_spec = pl.BlockSpec((1, Cin, hw_blk), lambda g: (0, 0, g))
        o_spec = pl.BlockSpec((1, Cout, hw_blk), lambda g: (0, 0, g))
    else:
        grid = (1,)
        x_spec = pl.BlockSpec((N, Cin, HW), lambda g: (0, 0, 0))
        o_spec = pl.BlockSpec((N, Cout, HW), lambda g: (0, 0, 0))

    out = pl.pallas_call(
        _semhead_kernel,
        out_shape=jax.ShapeDtypeStruct((N, Cout, HW), out_dtype),
        grid=grid,
        in_specs=[
            x_spec,
            pl.BlockSpec((Cout, Cin), lambda g: (0, 0)),   # resident weights
            pl.BlockSpec((Cout, 1), lambda g: (0, 0)),     # resident bias
        ],
        out_specs=o_spec,
        compiler_params=pltpu.CompilerParams(
            dimension_semantics=("parallel",)),
    )(x_flat, w2, b2)

    return out.reshape(N, Cout, H, W)


def sem_head_forward(x_nchw, params, downsample_factor):
    """Mirror of SemHead.forward: returns a dict keyed on downsample_factor."""
    y = sem_head_conv1x1(x_nchw, params["weight"], params["bias"])
    return {f"semantic_image_{downsample_factor}": y}


# ----------------------------------------------------------------------------
# Parameter init (mimics PyTorch Conv2d default init for a 1x1 kernel)
# ----------------------------------------------------------------------------
def init_sem_head_params(key, in_channels, n_classes):
    kw, kb = jax.random.split(key)
    bound = 1.0 / jnp.sqrt(jnp.float32(in_channels))   # fan_in = Cin * 1 * 1
    weight = jax.random.uniform(kw, (n_classes, in_channels), jnp.float32,
                                -bound, bound)
    bias = jax.random.uniform(kb, (n_classes,), jnp.float32, -bound, bound)
    return {"weight": weight, "bias": bias}


# ----------------------------------------------------------------------------
# Pure-JAX reference for validation
# ----------------------------------------------------------------------------
def ref_sem_head(x_nchw, params, downsample_factor):
    w = params["weight"]                                   # (Cout, Cin)
    b = params["bias"]                                     # (Cout,)
    y = jnp.einsum("oc,nchw->nohw", w, x_nchw,
                   precision=lax.Precision.HIGHEST)
    y = y + b.reshape(1, -1, 1, 1)
    return {f"semantic_image_{downsample_factor}": y}


# ----------------------------------------------------------------------------
if __name__ == "__main__":
    key = jax.random.PRNGKey(0)
    N, Cin, H, W = 2, 32, 16, 16
    n_classes = 8
    downsample_factor = 4

    kx, kp = jax.random.split(key)
    x = jax.random.normal(kx, (N, Cin, H, W), jnp.float32)
    params = init_sem_head_params(kp, Cin, n_classes)

    out = sem_head_forward(x, params, downsample_factor)
    out = jax.tree_util.tree_map(jax.block_until_ready, out)

    key_name = f"semantic_image_{downsample_factor}"
    assert set(out.keys()) == {key_name}, out.keys()
    y = out[key_name]
    assert y.shape == (N, n_classes, H, W), y.shape
    assert y.dtype == x.dtype, y.dtype

    ref = jax.block_until_ready(
        ref_sem_head(x, params, downsample_factor)[key_name])
    max_err = float(jnp.max(jnp.abs(y.astype(jnp.float32) - ref)))
    assert jnp.allclose(y.astype(jnp.float32), ref, rtol=1e-3, atol=1e-3), max_err

    print("KERNEL_OK")
</pallas_src>

<mosaic_0001>
module attributes {stable_mosaic.version = 11 : i64} {
  func.func @_semhead_kernel(%arg0: i32, %arg1: memref<1x32x256xf32, #tpu.memory_space<vmem>>, %arg2: memref<8x32xf32, #tpu.memory_space<vmem>>, %arg3: memref<8x1xf32, #tpu.memory_space<vmem>>, %arg4: memref<1x8x256xf32, #tpu.memory_space<vmem>>) attributes {dimension_semantics = [#tpu.dimension_semantics<parallel>], iteration_bounds = array<i64: 2>, scalar_prefetch = 0 : i64, scratch_operands = 0 : i64, tpu.core_type = #tpu.core_type<tc>, window_params = [{transform_indices = @transform_0, window_bounds = array<i64: 1, 32, 256>}, {pipeline_mode = #tpu.pipeline_mode<synchronous>, transform_indices = @transform_1, window_bounds = array<i64: 8, 32>}, {pipeline_mode = #tpu.pipeline_mode<synchronous>, transform_indices = @transform_2, window_bounds = array<i64: 8, 1>}, {transform_indices = @transform_3, window_bounds = array<i64: 1, 8, 256>}]} {
    %c0 = arith.constant 0 : index
    %c0_0 = arith.constant 0 : index
    %0 = vector.load %arg2[%c0, %c0_0] : memref<8x32xf32, #tpu.memory_space<vmem>>, vector<8x32xf32>
    %c0_1 = arith.constant 0 : index
    %c0_2 = arith.constant 0 : index
    %1 = vector.load %arg3[%c0_1, %c0_2] : memref<8x1xf32, #tpu.memory_space<vmem>>, vector<8x1xf32>
    %c0_3 = arith.constant 0 : index
    %c0_4 = arith.constant 0 : index
    %c0_5 = arith.constant 0 : index
    %2 = vector.load %arg1[%c0_3, %c0_4, %c0_5] : memref<1x32x256xf32, #tpu.memory_space<vmem>>, vector<1x32x256xf32>
    %3 = vector.shape_cast %2 : vector<1x32x256xf32> to vector<32x256xf32>
    %cst = arith.constant dense<0.000000e+00> : vector<8x256xf32>
    %4 = tpu.matmul %0, %3, %cst {dimension_numbers = #tpu.dot_dimension_numbers<[1], [0], [0], [1], [0, 0, 1, 1], [], []>, precision = #tpu.contract_precision<fp32>} : vector<8x32xf32>, vector<32x256xf32>, vector<8x256xf32> -> vector<8x256xf32>
    %5 = vector.broadcast %1 : vector<8x1xf32> to vector<8x256xf32>
    %6 = arith.addf %4, %5 : vector<8x256xf32>
    %c0_6 = arith.constant 0 : index
    %c0_7 = arith.constant 0 : index
    %c0_8 = arith.constant 0 : index
    %7 = vector.load %arg4[%c0_6, %c0_7, %c0_8] : memref<1x8x256xf32, #tpu.memory_space<vmem>>, vector<1x8x256xf32>
    %8 = vector.shape_cast %7 : vector<1x8x256xf32> to vector<8x256xf32>
    %9 = vector.shape_cast %6 : vector<8x256xf32> to vector<1x8x256xf32>
    tpu.vector_store %arg4[%c0_6, %c0_7, %c0_8], %9 {strides = array<i32>} : memref<1x8x256xf32, #tpu.memory_space<vmem>>, vector<1x8x256xf32>,
    return
  }
  func.func @transform_0(%arg0: i32) -> (i32, i32, i32) {
    %c0_i32 = arith.constant 0 : i32
    %c0_i32_0 = arith.constant 0 : i32
    %c0_i32_1 = arith.constant 0 : i32
    return %arg0, %c0_i32, %c0_i32_0 : i32, i32, i32
  }
  func.func @transform_1(%arg0: i32) -> (i32, i32) {
    %c0_i32 = arith.constant 0 : i32
    %c0_i32_0 = arith.constant 0 : i32
    %c0_i32_1 = arith.constant 0 : i32
    return %c0_i32, %c0_i32_0 : i32, i32
  }
  func.func @transform_2(%arg0: i32) -> (i32, i32) {
    %c0_i32 = arith.constant 0 : i32
    %c0_i32_0 = arith.constant 0 : i32
    %c0_i32_1 = arith.constant 0 : i32
    return %c0_i32, %c0_i32_0 : i32, i32
  }
  func.func @transform_3(%arg0: i32) -> (i32, i32, i32) {
    %c0_i32 = arith.constant 0 : i32
    %c0_i32_0 = arith.constant 0 : i32
    %c0_i32_1 = arith.constant 0 : i32
    return %arg0, %c0_i32, %c0_i32_0 : i32, i32, i32
  }
}

</mosaic_0001>

<bundles_post_ra>
// kernel: tpu_custom_call.1
= control target key start
LH: loop header
LB: loop body
LE: loop exit
PB: predicated region body
PF: predicated region fallthrough
CT: control target
= control target key end

     0   :  { %8 = vsyncpa [#allocation3], 0  ;;  %s1329_s0 = inlined_call_operand.hbm [shape: f32[2,32,256], index: 0, kind: input, shape index: {}]   ;;  %s1330_s1 = inlined_call_operand.vmem [shape: f32[8,32], index: 1, kind: input, shape index: {}]   ;;  %s1331_s2 = inlined_call_operand.vmem [shape: f32[8,1], index: 2, kind: input, shape index: {}]   ;;  %s1332_s3 = inlined_call_operand.hbm [shape: f32[2,8,256], index: 3, kind: output, shape index: {}]  }
   0x1   :  { %10 = vsyncpa [#allocation3 + $0x1], 0 }
   0x2   :  { %11 = vsyncpa [#allocation4], 0 }
   0x3   :  { %13 = vsyncpa [#allocation4 + $0x1], 0  ;;  %s1089_s12 = smov 0   ;;  %s1091_s13 = smov 0  }
   0x4   :  { %s1093_s14 = smov 0   ;;  %s1095_s15 = smov 0  }
   0x5 LB: > { %s1110_s16 = sadd.s32 4294967295, %s1061_s15   ;;  %s838_s17 = sadd.s32 4294967294, %s1061_s15   ;;  %s1061_s15 = sphi %s1095_s15, %s1345_s15   ;;  %s1057_s14 = sphi %s1093_s14, %s1344_s14   ;;  %s1053_s13 = sphi %s1091_s13, %s1343_s13   ;;  %s1049_s12 = sphi %s1089_s12, %s1342_s12  }
   0x6   : > { %s1114_s18 = sadd.s32 1, %s1061_s15   ;;  %s26_s19 = sadd.s32 1, %s1057_s14 }
   0x7   : > { %s23_s20 = ssub.s32 %s1061_s15, %s1114_s18  ;;  %p33_p0 = scmp.ne.s32.totalorder %s1057_s14, %s1053_s13 }
   0x8   : > { %p24_p1 = scmp.eq.s32.totalorder %s23_s20, 0  ;;  %p34_p2 = scmp.eq.s32.totalorder %s1061_s15, 0 }
   0x9   : > { %p39_p3 = scmp.ne.s32.totalorder %s1053_s13, %s1049_s12  ;;  %p40_p4 = scmp.eq.s32.totalorder %s1110_s16, 0 }
   0xa   : > { %s1126_s21 = scalar_select %p24_p1, %s1057_s14, %s26_s19  }
   0xb   : > { %p1128_p5 = por %p34_p2, %p33_p0  ;;  %p1132_p6 = por %p40_p4, %p39_p3 }
   0xc   : > { %p105_p7 = scmp.eq.s32.totalorder %s1110_s16, 1  ;;  %p111_p8 = scmp.eq.s32.totalorder %s838_s17, 1 }
   0xd   : > { %p926_p10 = scmp.lt.s32.totalorder %s1061_s15, 2  ;;  %s137_s26 = sand.u32 1, %s1057_s14  }
   0xe   : > { %p1139_p11 = por %p105_p7, %p33_p0  ;;  %p1143_p12 = por %p111_p8, %p39_p3 }
   0xf   : > { %s852_s27 = sshll.u32 %s1061_s15, 10  ;;  %s841_s28 = sshll.u32 %s137_s26, 6 }
  0x10   : > { %s1336_s24 = scalar_select %p1139_p11, 1, 0 }
  0x11   : > { %s1337_s25 = scalar_select %p1143_p12, 1, 0 }
  0x12   : > { %s1152_s4 = scalar_lea.hbm %s1329_s0, %s852_s27  ;;  %s141_s5 = scalar_lea.vmem [#allocation2], %s841_s28 }
  0x13   : > { %s148_s6 = sshll.u32 %s141_s5, 4  ;;  %p1156_p13 = pnand %p926_p10, %p1128_p5  ;;  %s1160_s6 = int_to_ptr.vmem [resolvable:$true] %s148_s6 }
  0x14   : > { %s1162_s8 = scalar_lea.sflag [#allocation3], %s137_s26  ;;  %s965_s9 = scalar_lea.hbm %s1152_s4, 1024 }
  0x15   : > { %p966_p0 = scmp.ne.s32.totalorder %s1152_s4, %s965_s9  ;;  %p967_p1 = pneg %p1156_p13 }
  0x16   : > { %s970_s17 = scalar_lea.hbm %s1329_s0, 2048  ;;  %p971_p4 = scmp.lt.u32.totalorder %s1152_s4, %s1329_s0 }
  0x17   : > { %p968_p2 = pnand %p967_p1, %p966_p0  ;;  %p972_p5 = scmp.lt.u32.totalorder %s970_s17, %s965_s9 }
  0x18   : > { %p974_p8 = scmp.lt.u32.totalorder %s965_s9, %s1152_s4 }
  0x19   : > { %p969_p3 = pneg %p968_p2  ;;  %p973_p7 = por %p972_p5, %p971_p4 }
  0x1b   : > { %p975_p10 = por %p974_p8, %p973_p7 }
  0x1d   : > { %p976_p9 = pnand %p975_p10, %p969_p3 }
  0x1f   : > { %979 = shalt.err (!%p976_p9)
}
  0x20   : > { %s980_s22 = scalar_lea.vmem %s1160_s6, 1024  ;;  %s1063_s26 = smov [#allocation2]  }
  0x21   : > { %p981_p0 = scmp.ne.s32.totalorder %s1160_s6, %s980_s22  ;;  %s985_s27 = sshll.u32 %s1063_s26, 4  ;;  %s986_s27 = int_to_ptr.vmem [resolvable:$false] %s985_s27 }
  0x22   : > { %s987_s28 = scalar_lea.vmem %s986_s27, 2048  ;;  %p988_p11 = scmp.lt.s32.totalorder %s1160_s6, %s986_s27 }
  0x23   : > { %p983_p2 = pnand %p981_p0, %p967_p1  ;;  %p989_p4 = scmp.lt.s32.totalorder %s987_s28, %s980_s22 }
  0x25   : > { %p984_p12 = pneg %p983_p2  ;;  %p990_p5 = por %p989_p4, %p988_p11 }
  0x27   : > { %p991_p7 = pnand %p990_p5, %p984_p12 }
  0x29   : > { %994 = shalt.err (!%p991_p7)
}
  0x2a   : > { %s1064_s29 = smov 256   ;;  %s1065_s30 = smov 16  }
  0x2b   : > { %921 = dma.hbm_to_vmem [thread:$0]  (!%p1156_p13), %s1152_s4, 1024, %s1160_s6, %s1162_s8, %s1064_s29, %s1064_s29, %s1065_s30  }
  0x2c   : > { %p844_p9 = scmp.ge.s32.totalorder %s1061_s15, 1  ;;  %p156_p1 = scmp.lt.s32.totalorder %s1061_s15, 3 }
  0x2e   : > { %p157_p3 = pnand %p844_p9, %p156_p1 }
  0x2f   : > { %s1193_s5 = sand.u32 (!%p157_p3), 1, %s1053_s13  }
  0x30   : > { %160 = sbr.rel (%p157_p3) target bundleno = 320 (0x140), region = 32  ;;  %s845_s9 = sshll.u32 (!%p157_p3), %s1193_s5, 6 }
  0x31   : > { %s163_s10 = scalar_lea.sflag (!%p157_p3), [#allocation3], %s1193_s5  ;;  %s166_s11 = scalar_lea.vmem (!%p157_p3), [#allocation2], %s845_s9 }
  0x37   : > { %1040 = dma.done.wait (%p1132_p6), %s163_s10, 1024  }
  0x38   : > { %1042 = vsyncadd (%p1132_p6), %s163_s10, 4294966272  ;;  %v1066_v0 = vmov 0.0   ;;  %v1067_v1 = vmov 0   ;;  %v192_v2 = vld [vmem:[%s166_s11 + $0x8] sm:$0xff]  ;;  %v194_v3 = vld [vmem:[%s166_s11 + $0x18] sm:$0xff]  ;;  %vm204_vm0 = vcmask 261120  }
  0x39   : > { %280 = vmatprep.mubr.f32.mxu1 %v1066_v0  ;;  %565 = vmatprep.mubr.f32.mxu0 %v1066_v0  ;;  %v191_v4 = vld [vmem:[%s166_s11] sm:$0xff]  ;;  %v208_v5 = vand.u32 4294901760, %v192_v2  ;;  %v212_v6 = vand.u32 4294901760, %v194_v3  ;;  %v193_v7 = vld [vmem:[%s166_s11 + $0x10] sm:$0xff]  ;;  %v196_v9 = vld [vmem:[%s166_s11 + $0x28] sm:$0xff]  ;;  %s846_s8 = sshll.u32 %s1193_s5, 4 }
  0x3a   : > { %964 = vset.pattern.permute.xlu0 %v1067_v1  ;;  %v210_v8 = vand.u32 4294901760, %v191_v4  ;;  %v198_v10 = vld [vmem:[%s166_s11 + $0x38] sm:$0xff]  ;;  %v214_v11 = vand.u32 4294901760, %v193_v7  ;;  %v216_v12 = vand.u32 4294901760, %v196_v9  ;;  %v195_v14 = vld [vmem:[%s166_s11 + $0x20] sm:$0xff]  ;;  %v197_v15 = vld [vmem:[%s166_s11 + $0x30] sm:$0xff] }
  0x3b   : > { %v220_v13 = vand.u32 4294901760, %v198_v10  ;;  %v189_v16 = vld [vmem:[%s1330_s1] sm:$0xff]  ;;  %v1206_v17 = vpack.c.bf16 %v212_v6, %v208_v5  ;;  %v1208_v18 = vsub.f32 %v192_v2, %v208_v5  ;;  %v1210_v19 = vsub.f32 %v194_v3, %v212_v6  ;;  %s853_s17 = sshll.u32 %s1110_s16, 8  ;;  %s188_s19 = scalar_lea.vmem [#allocation5], %s846_s8 }
  0x3c   : > { %v1212_v20 = vsub.f32 %v191_v4, %v210_v8  ;;  %v190_v21 = vld [vmem:[%s1331_s2] sm:$0xff]  ;;  %v1217_v22 = vpack.c.bf16 %v214_v11, %v210_v8  ;;  %v1219_v23 = vsub.f32 %v193_v7, %v214_v11  ;;  %v1223_v25 = vsub.f32 %v196_v9, %v216_v12  ;;  %s768_s20 = sshll.u32 %s188_s19, 4  ;;  %s1285_s27 = scalar_lea.hbm %s1332_s3, %s853_s17  ;;  %s1287_s20 = int_to_ptr.vmem [resolvable:$true] %s768_s20 }
  0x3d   : > { %v1221_v24 = vpack.c.bf16 %v220_v13, %v216_v12  ;;  %201 = vperm.xlu0 %964, %v190_v21   ;;  %855 = vmatprep.subr.bf16.mxu1 %v1206_v17  ;;  %v1227_v26 = vsub.f32 %v198_v10, %v220_v13  ;;  %v218_v27 = vand.u32 4294901760, %v195_v14  ;;  %v222_v28 = vand.u32 4294901760, %v197_v15  ;;  %s754_s28 = scalar_lea.sflag [#allocation4], %s1193_s5  ;;  %s995_s29 = scalar_lea.vmem %s1287_s20, 256 }
  0x3e   : > { %879 = vmatprep.subr.bf16.mxu0 %v1206_v17  ;;  %v206_v29 = vsel %vm204_vm0, %v189_v16, 0  ;;  %857 = vmatpush1.bf16.msra.mxu1 %v1217_v22  ;;  %v294_v31 = vand.u32 4294901760, %v1208_v18  ;;  %v306_v32 = vand.u32 4294901760, %v1210_v19  ;;  %v300_v33 = vand.u32 4294901760, %v1212_v20  ;;  %p996_p6 = scmp.ne.s32.totalorder %s1287_s20, %s995_s29  ;;  %p1339_p11 = scmp.ne.s32.totalorder %s1336_s24, 0 }
  0x3f   : > { %881 = vmatpush1.bf16.msra.mxu0 %v1217_v22  ;;  %v1232_v30 = vand.u32 4294901760, %v206_v29  ;;  %859 = vmatprep.subr.bf16.mxu1 %v1221_v24  ;;  %v1239_v34 = vpack.c.bf16 %v222_v28, %v218_v27  ;;  %v1241_v35 = vsub.f32 %v195_v14, %v218_v27  ;;  %v1243_v36 = vsub.f32 %v197_v15, %v222_v28  ;;  %s1068_s16 = smov [#allocation5]  }
  0x40   : > { %883 = vmatprep.subr.bf16.mxu0 %v1221_v24  ;;  %v312_v37 = vand.u32 4294901760, %v1219_v23  ;;  %v295_v39 = vsub.f32 %v1208_v18, %v294_v31  ;;  %v307_v40 = vsub.f32 %v1210_v19, %v306_v32  ;;  %v886_v41 = vpack.c.bf16 %v306_v32, %v294_v31  ;;  %p997_p12 = pnand %p996_p6, %p1339_p11  ;;  %s999_s30 = sshll.u32 %s1068_s16, 4  ;;  %s1000_s30 = int_to_ptr.vmem [resolvable:$false] %s999_s30 }
  0x41   : > { %v282_v38 = vsub.f32 %v206_v29, %v1232_v30  ;;  %v301_v42 = vsub.f32 %v1212_v20, %v300_v33  ;;  %v318_v45 = vand.u32 4294901760, %v1223_v25  ;;  %v330_v49 = vand.u32 4294901760, %v1227_v26  ;;  %s1001_s9 = scalar_lea.vmem %s1000_s30, 512  ;;  %p1002_p8 = scmp.lt.s32.totalorder %s1287_s20, %s1000_s30 }
  0x42   : > { %v313_v43 = vsub.f32 %v1219_v23, %v312_v37  ;;  %v888_v44 = vpack.c.bf16 %v312_v37, %v300_v33  ;;  %861 = vmatpush1.bf16.msra.mxu1 %v1239_v34  ;;  %v296_v47 = vand.u32 4294901760, %v295_v39  ;;  %v308_v48 = vand.u32 4294901760, %v307_v40  ;;  %p998_p13 = pneg %p997_p12  ;;  %p1003_p10 = scmp.lt.s32.totalorder %s1001_s9, %s995_s29 }
  0x43   : > { %885 = vmatpush1.bf16.msra.mxu0 %v1239_v34  ;;  %v283_v46 = vand.u32 4294901760, %v282_v38  ;;  %v302_v50 = vand.u32 4294901760, %v301_v42  ;;  %v319_v52 = vsub.f32 %v1223_v25, %v318_v45  ;;  %v324_v53 = vand.u32 4294901760, %v1241_v35 }
  0x44   : > { %887 = vmatprep.subr.bf16.mxu0 %v886_v41  ;;  %v314_v51 = vand.u32 4294901760, %v313_v43  ;;  %v862_v55 = vpack.c.bf16 %v308_v48, %v296_v47  ;;  %v331_v56 = vsub.f32 %v1227_v26, %v330_v49  ;;  %v890_v57 = vpack.c.bf16 %v330_v49, %v318_v45  ;;  %p1004_p0 = por %p1003_p10, %p1002_p8 }
  0x45   : > { %v284_v54 = vsub.f32 %v282_v38, %v283_v46  ;;  %v320_v59 = vand.u32 4294901760, %v319_v52  ;;  %v325_v60 = vsub.f32 %v1241_v35, %v324_v53  ;;  %v336_v61 = vand.u32 4294901760, %v1243_v36 }
  0x46   : > { %569 = vmatmul.mubr.f32.vlgmr.msra.gmra.mrb[0].mxu0 %v283_v46  ;;  %v864_v58 = vpack.c.bf16 %v314_v51, %v302_v50  ;;  %863 = vmatprep.subr.bf16.mxu1 %v862_v55  ;;  %v332_v63 = vand.u32 4294901760, %v331_v56  ;;  %v870_v6 = vpack.c.bf16 %v1210_v19, %v1208_v18  ;;  %v872_v8 = vpack.c.bf16 %v1219_v23, %v1212_v20  ;;  %p1005_p2 = pnand %p1004_p0, %p998_p13 }
  0x47   : > { %v285_v62 = vand.u32 4294901760, %v284_v54  ;;  %889 = vmatpush1.bf16.msra.mxu0 %v888_v44  ;;  %v326_v1 = vand.u32 4294901760, %v325_v60  ;;  %v337_v2 = vsub.f32 %v1243_v36, %v336_v61  ;;  %v892_v3 = vpack.c.bf16 %v336_v61, %v324_v53  ;;  %663 = vmatprep.mubr.f32.mxu0 %v1066_v0 }
  0x48   : > { %891 = vmatprep.subr.bf16.mxu0 %v890_v57  ;;  %v866_v4 = vpack.c.bf16 %v332_v63, %v320_v59  ;;  %v874_v9 = vpack.c.bf16 %v1227_v26, %v1223_v25  ;;  %v876_v10 = vpack.c.bf16 %v1243_v36, %v1241_v35 }
  0x49   : > { %286 = vmatmul.mubr.f32.vlgmr.msra.gmra.mrb[0].mxu1 %v285_v62  ;;  %v338_v5 = vand.u32 4294901760, %v337_v2 }
  0x4a   : > { %865 = vmatpush1.bf16.msra.mxu1 %v864_v58  ;;  %396 = vmatprep.mubr.f32.mxu1 %v1066_v0 }
  0x4b   : > { %867 = vmatprep.subr.bf16.mxu1 %v866_v4  ;;  %893 = vmatpush1.bf16.msra.mxu0 %v892_v3  ;;  %v868_v7 = vpack.c.bf16 %v338_v5, %v326_v1 }
  0x4c   : > { %895 = vmatprep.subr.bf16.mxu0 %v1206_v17 }
  0x4e   : > { %869 = vmatpush1.bf16.msra.mxu1 %v868_v7  ;;  %665 = vmatmul.mubr.f32.vlgmr.msra.gmra.mrb[0].mxu0 %v1232_v30 }
  0x4f   : > { %871 = vmatprep.subr.bf16.mxu1 %v870_v6  ;;  %897 = vmatpush1.bf16.msra.mxu0 %v1217_v22 }
  0x50   : > { %899 = vmatprep.subr.bf16.mxu0 %v1221_v24  ;;  %743 = vmatprep.mubr.f32.mxu0 %v1066_v0 }
  0x51   : > { %398 = vmatmul.mubr.f32.vlgmr.msra.gmra.mrb[0].mxu1 %v1232_v30 }
  0x52   : > { %873 = vmatpush1.bf16.msra.mxu1 %v872_v8  ;;  %484 = vmatprep.mubr.f32.mxu1 %v1066_v0 }
  0x53   : > { %875 = vmatprep.subr.bf16.mxu1 %v874_v9  ;;  %901 = vmatpush1.bf16.msra.mxu0 %v1239_v34 }
  0x56   : > { %877 = vmatpush1.bf16.msra.mxu1 %v876_v10  ;;  %745 = vmatmul.mubr.f32.vlgmr.msra.gmra.mrb[0].mxu0 %v1232_v30 }
  0x59   : > { %487 = vmatmul.mubr.f32.vlgmr.msra.gmra.mrb[0].mxu1 %v282_v38 }
  0xbc   : > { %v202_v12 = vpop.permute.xlu0 %201 }
 0x129   : > { %v746_v11 = vpop.f32.mrb[0].mxu0 }
 0x12a   : > { %v748_v13 = vpop.f32.mrb[1].mxu0 }
 0x12c   : > { %v488_v14 = vpop.f32.mrb[0].mxu1 }
 0x12d   : > { %v902_v15 = vadd.f32 %v488_v14, %v202_v12  ;;  %v490_v16 = vpop.f32.mrb[1].mxu1 }
 0x12e   : > { %v904_v0 = vadd.f32 %v490_v16, %v202_v12 }
 0x12f   : > { %v903_v17 = vadd.f32 %v902_v15, %v746_v11 }
 0x130   : > { %v905_v18 = vadd.f32 %v904_v0, %v748_v13 }
 0x131   : > { %751 = vst [vmem:[%s188_s19] sm:$0xff] %v903_v17 }
 0x132   : > { %752 = vst [vmem:[%s188_s19 + $0x8] sm:$0xff] %v905_v18 }
 0x133   : > { %1008 = shalt.err (!%p1005_p2)
}
 0x134   : > { %s1009_s5 = scalar_lea.hbm %s1285_s27, 256  ;;  %s1013_s23 = scalar_lea.hbm %s1332_s3, 512 }
 0x135   : > { %p1010_p4 = scmp.ne.s32.totalorder %s1285_s27, %s1009_s5  ;;  %p1014_p9 = scmp.lt.u32.totalorder %s1285_s27, %s1332_s3 }
 0x136   : > { %p1015_p1 = scmp.lt.u32.totalorder %s1013_s23, %s1009_s5  ;;  %p1017_p6 = scmp.lt.u32.totalorder %s1009_s5, %s1285_s27 }
 0x137   : > { %p1011_p5 = pnand %p1010_p4, %p1339_p11 }
 0x138   : > { %p1016_p3 = por %p1015_p1, %p1014_p9 }
 0x139   : > { %p1012_p7 = pneg %p1011_p5 }
 0x13a   : > { %p1018_p12 = por %p1017_p6, %p1016_p3 }
 0x13c   : > { %p1019_p13 = pnand %p1018_p12, %p1012_p7 }
 0x13e   : > { %1022 = shalt.err (!%p1019_p13)
}
 0x13f   : > { %916 = dma.vmem_to_hbm [thread:$0]  (%p1339_p11), %s1287_s20, 256, %s1285_s27, %s754_s28  }
 0x140 PF: > { %s780_s7 = sand.u32 1, %s1049_s12   ;;  %p1340_p8 = scmp.ne.s32.totalorder %s1337_s25, 0 }
 0x141   : > { %p1341_p10 = scmp.ge.s32.totalorder %s1061_s15, 2  ;;  %s781_s8 = scalar_lea.sflag [#allocation4], %s780_s7 }
 0x143   : > { %p923_p0 = pnand %p1341_p10, %p1340_p8 }
 0x145   : > { %1044 = dma.done.wait (!%p923_p0), %s781_s8, 256  }
 0x146   : > { %1046 = vsyncadd (!%p923_p0), %s781_s8, 4294967040  ;;  %p16_p2 = scmp.ge.s32.totalorder %s1114_s18, 4   ;;  %s1342_s12 = smov %s1053_s13 }
 0x147   : > { %s1343_s13 = smov %s1057_s14  ;;  %s1344_s14 = smov %s1126_s21 }
 0x148   : > { %s1345_s15 = smov %s1114_s18  ;;  %18 = sbr.rel (!%p16_p2) target bundleno = 5 (0x5), region = 77 }
 0x14f   :  { %786 = vsyncpa [#allocation3], 1 }
 0x150   :  { %788 = vsyncpa [#allocation3 + $0x1], 1 }
 0x151   :  { %789 = vsyncpa [#allocation4], 1 }
 0x152   :  { %791 = vsyncpa [#allocation4 + $0x1], 1 }

</bundles_post_ra>
